<compile_context>
chip_gen: v7x
topology: tpu7x:2x2x1
jax: 0.10.0
libtpu: 0.0.40
codegen_flags: <defaults>
</compile_context>

<pallas_src>
import jax
import jax.numpy as jnp
from jax import lax
from jax.experimental import pallas as pl
from jax.experimental.pallas import tpu as pltpu

EPS = 1e-5
NEG_SLOPE = 0.2


def _round_up(x, m):
    return (x + m - 1) // m * m


def _vmem_limit_bytes():
    # Per-generation scoped-VMEM limit: ~3/4 of physical VMEM, capped at 96 MiB
    # (v7x: 64 MiB -> 48 MiB, v5e/v6e: 128 MiB -> 96 MiB), safe 32 MiB fallback.
    try:
        cap = int(pltpu.get_tpu_info().vmem_capacity_bytes)
        return max(32 * 1024 * 1024, min((cap * 3) // 4, 96 * 1024 * 1024))
    except Exception:
        return 32 * 1024 * 1024


# ---------- Pass 1: conv-as-matmul (bf16 in, f32 acc) + per-tile partial BN stats ----------
def _conv_stats_kernel(p_ref, w_ref, y_ref, psum_ref, psumsq_ref):
    y = jnp.dot(p_ref[...], w_ref[...], preferred_element_type=jnp.float32)
    # BN partials from the f32 accumulator (before the bf16 downcast) so the batch
    # statistics pick up no bf16 quantization bias. Zero-padded rows contribute zero.
    psum_ref[...] = jnp.sum(y, axis=0, keepdims=True).reshape(1, 1, -1)
    psumsq_ref[...] = jnp.sum(y * y, axis=0, keepdims=True).reshape(1, 1, -1)
    # bf16 intermediate: halves pass-1 writeback and pass-2 read (both HBM-bound).
    y_ref[...] = y.astype(y_ref.dtype)


# ---------- Pass 2: fused BN scale/shift + LeakyReLU ----------
def _bn_lrelu_kernel(y_ref, scale_ref, shift_ref, o_ref):
    y = y_ref[...].astype(jnp.float32) * scale_ref[...] + shift_ref[...]   # one FMA pass
    o_ref[...] = jnp.where(y >= 0, y, NEG_SLOPE * y)                       # LeakyReLU(0.2)


def _im2col_nhwc(x_nhwc, k, stride, padding):
    """(N, H, W, Cin) -> (N*Ho*Wo, k*k*Cin) patches, columns ordered (kh, kw, cin)."""
    n, h, w, cin = x_nhwc.shape
    ho = (h + 2 * padding - k) // stride + 1
    wo = (w + 2 * padding - k) // stride + 1
    xp = jnp.pad(x_nhwc, ((0, 0), (padding, padding), (padding, padding), (0, 0)))
    cols = []
    for kh in range(k):
        for kw in range(k):
            cols.append(xp[:, kh:kh + stride * (ho - 1) + 1:stride,
                            kw:kw + stride * (wo - 1) + 1:stride, :])
    patches = jnp.stack(cols, axis=3).reshape(n * ho * wo, k * k * cin)
    return patches, ho, wo


def _pick_tm(m, kkc_p, cout_p, vmem_limit):
    """Largest pass-1 M-tile whose working set (double-buffered bf16 patches + bf16 y +
    the constant-index weight block, conservatively counted double-buffered) stays well
    inside the scoped VMEM budget."""
    budget = (vmem_limit * 2) // 3
    weight_bytes = 2 * kkc_p * cout_p * 2
    per_row = 2 * kkc_p * 2 + 2 * cout_p * 2
    avail = max(budget - weight_bytes, per_row * 128)
    tm = max(128, (avail // per_row) // 128 * 128)
    tm = min(tm, 4096)
    m128 = _round_up(m, 128)
    tm = min(tm, m128)
    # Keep >= 2 grid steps when there is enough work so both v7x TensorCores get a share.
    if m128 >= 256:
        tm = min(tm, max(128, (m128 // 2) // 128 * 128))
    return tm


def _pick_tm2(tm, num_tiles, cout_p, vmem_limit):
    """Pass 2 is a cheap streaming FMA: use a much larger M-tile (a multiple of tm that
    divides m_pad) to amortize the ~0.35 us/step pipeline overhead."""
    budget = (vmem_limit * 2) // 3
    per_row = 2 * cout_p * 2 + 2 * cout_p * 4      # dbuf bf16 in + dbuf f32 out
    max_rows = min(4096, max(tm, budget // per_row))
    best = 1
    for f in range(1, num_tiles + 1):
        if num_tiles % f == 0 and f * tm <= max_rows:
            best = f
    return tm * best


def _forward_impl(x_nchw, conv_w, bn_gamma, bn_beta, k, padding, stride, lane_pad):
    n, cin, h, w = x_nchw.shape
    cout = conv_w.shape[0]

    # bf16 before the layout transpose + im2col so the 9x-expanded patches tensor is
    # built / written / read in bf16 (it is the largest HBM consumer of the whole op).
    x_nhwc = jnp.transpose(x_nchw.astype(jnp.bfloat16), (0, 2, 3, 1))
    patches, ho, wo = _im2col_nhwc(x_nhwc, k, stride, padding)
    m = n * ho * wo
    kkc = k * k * cin

    if lane_pad:
        kkc_p = _round_up(kkc, 128)
        cout_p = _round_up(cout, 128)
    else:
        # Small Cout is NOT padded to 128: masked lane stores cost far less than 16x padded
        # HBM traffic. Blocks always span the full Cout / K*K*Cin extents, which satisfies
        # the (8, 128) block-shape rule regardless of alignment.
        kkc_p = kkc
        cout_p = cout if cout < 128 else _round_up(cout, 128)

    vmem_limit = _vmem_limit_bytes()
    tm = _pick_tm(m, kkc_p, cout_p, vmem_limit)
    m_pad = _round_up(m, tm)
    num_tiles = m_pad // tm

    if m_pad != m or kkc_p != kkc:
        # Zero rows give exactly-zero conv outputs (no bias), so BN sums are unaffected.
        patches = jnp.pad(patches, ((0, m_pad - m), (0, kkc_p - kkc)))

    # PyTorch conv weight (Cout, Cin, K, K) -> (K, K, Cin, Cout) -> (K*K*Cin, Cout), bf16.
    w_mat = jnp.transpose(conv_w, (2, 3, 1, 0)).reshape(kkc, cout).astype(jnp.bfloat16)
    if kkc_p != kkc or cout_p != cout:
        w_mat = jnp.pad(w_mat, ((0, kkc_p - kkc), (0, cout_p - cout)))

    cparams = pltpu.CompilerParams(dimension_semantics=("parallel",),
                                   vmem_limit_bytes=vmem_limit)

    y_bf16, psum, psumsq = pl.pallas_call(
        _conv_stats_kernel,
        out_shape=(jax.ShapeDtypeStruct((m_pad, cout_p), jnp.bfloat16),
                   jax.ShapeDtypeStruct((num_tiles, 1, cout_p), jnp.float32),
                   jax.ShapeDtypeStruct((num_tiles, 1, cout_p), jnp.float32)),
        grid=(num_tiles,),
        in_specs=[
            pl.BlockSpec((tm, kkc_p), lambda i: (i, 0)),
            pl.BlockSpec((kkc_p, cout_p), lambda i: (0, 0)),   # grid-invariant weight block
        ],
        out_specs=(
            pl.BlockSpec((tm, cout_p), lambda i: (i, 0)),
            pl.BlockSpec((1, 1, cout_p), lambda i: (i, 0, 0)),
            pl.BlockSpec((1, 1, cout_p), lambda i: (i, 0, 0)),
        ),
        compiler_params=cparams,
    )(patches, w_mat)

    # Tiny per-channel glue (O(num_tiles*Cout)): reduce partials, fold BN into scale/shift.
    s = jnp.sum(psum, axis=(0, 1))
    ss = jnp.sum(psumsq, axis=(0, 1))
    mean = s / m
    var = jnp.maximum(ss / m - mean * mean, 0.0)   # biased variance (PyTorch BN forward)
    gamma_p = jnp.zeros((cout_p,), jnp.float32).at[:cout].set(bn_gamma.astype(jnp.float32))
    beta_p = jnp.zeros((cout_p,), jnp.float32).at[:cout].set(bn_beta.astype(jnp.float32))
    scale = gamma_p * lax.rsqrt(var + EPS)
    shift = beta_p - mean * scale
    scale_row = scale.reshape(1, cout_p)
    shift_row = shift.reshape(1, cout_p)

    tm2 = _pick_tm2(tm, num_tiles, cout_p, vmem_limit)
    num_tiles2 = m_pad // tm2

    out_pad = pl.pallas_call(
        _bn_lrelu_kernel,
        out_shape=jax.ShapeDtypeStruct((m_pad, cout_p), jnp.float32),
        grid=(num_tiles2,),
        in_specs=[
            pl.BlockSpec((tm2, cout_p), lambda i: (i, 0)),
            pl.BlockSpec((1, cout_p), lambda i: (0, 0)),
            pl.BlockSpec((1, cout_p), lambda i: (0, 0)),
        ],
        out_specs=pl.BlockSpec((tm2, cout_p), lambda i: (i, 0)),
        compiler_params=cparams,
    )(y_bf16, scale_row, shift_row)

    out_nhwc = out_pad[:m, :cout].reshape(n, ho, wo, cout)
    # TODO(synk): fold this NHWC->NCHW permute into pass 2 (channel-major output block) or
    # keep NHWC end-to-end if the surrounding model allows; it is an extra HBM round trip.
    return jnp.transpose(out_nhwc, (0, 3, 1, 2))


def downblock2d_forward(x_nchw, conv_w, conv_b, bn_gamma, bn_beta,
                        kernel_size=3, padding=1, stride=2):
    """x: (N, Cin, H, W) float32 (PyTorch NCHW). Returns (N, Cout, Ho, Wo) float32."""
    # Conv bias intentionally unused: training-mode BatchNorm subtracts the per-channel
    # batch mean, which cancels a per-channel conv bias exactly.
    # TODO(synk): reinstate conv_b if an eval-mode (running-stats) BN path is ever added.
    del conv_b
    try:
        return _forward_impl(x_nchw, conv_w, bn_gamma, bn_beta,
                             kernel_size, padding, stride, lane_pad=False)
    except Exception:
        # Conservative fallback: 128-lane-padded GEMM operands (known-good Mosaic shapes),
        # in case the un-padded small-Cout / small-K*K*Cin matmul is rejected by lowering.
        return _forward_impl(x_nchw, conv_w, bn_gamma, bn_beta,
                             kernel_size, padding, stride, lane_pad=True)


def _reference(x_nchw, conv_w, conv_b, bn_gamma, bn_beta, stride=2, padding=1):
    y = lax.conv_general_dilated(
        x_nchw, conv_w, window_strides=(stride, stride),
        padding=((padding, padding), (padding, padding)),
        dimension_numbers=("NCHW", "OIHW", "NCHW"))
    y = y + conv_b[None, :, None, None]
    mean = jnp.mean(y, axis=(0, 2, 3), keepdims=True)
    var = jnp.mean((y - mean) ** 2, axis=(0, 2, 3), keepdims=True)
    y = (y - mean) / jnp.sqrt(var + EPS)
    y = y * bn_gamma[None, :, None, None] + bn_beta[None, :, None, None]
    return jnp.where(y >= 0, y, NEG_SLOPE * y)


if __name__ == "__main__":
    key = jax.random.PRNGKey(0)
    k_x, k_w, k_b = jax.random.split(key, 3)

    N, Cin, H, W = 2, 4, 16, 16
    Cout, K = 8, 3

    x = jax.random.normal(k_x, (N, Cin, H, W), dtype=jnp.float32)
    # Deterministic synthetic params (Conv2d default-like scale); BN: gamma=1, beta=0.
    fan_in = Cin * K * K
    bound = 1.0 / (fan_in ** 0.5)
    conv_w = jax.random.uniform(k_w, (Cout, Cin, K, K), jnp.float32, -bound, bound)
    conv_b = jax.random.uniform(k_b, (Cout,), jnp.float32, -bound, bound)
    bn_gamma = jnp.ones((Cout,), jnp.float32)
    bn_beta = jnp.zeros((Cout,), jnp.float32)

    out = downblock2d_forward(x, conv_w, conv_b, bn_gamma, bn_beta)
    out = jax.block_until_ready(out)

    ref = _reference(x, conv_w, conv_b, bn_gamma, bn_beta)
    assert out.shape == (N, Cout, H // 2, W // 2), out.shape
    # bf16 patches/weights/intermediate (f32 MXU accumulation + f32 epilogue) and
    # BN normalization amplify rounding by ~1/std -> loosened tolerance vs the f32 reference.
    assert jnp.allclose(out, ref, atol=4e-2, rtol=4e-2), float(jnp.max(jnp.abs(out - ref)))

    print("KERNEL_OK")
</pallas_src>

<mosaic_0001>
module attributes {stable_mosaic.version = 11 : i64} {
  func.func @_conv_stats_kernel(%arg0: i32, %arg1: memref<128x36xbf16, #tpu.memory_space<vmem>>, %arg2: memref<36x8xbf16, #tpu.memory_space<vmem>>, %arg3: memref<128x8xbf16, #tpu.memory_space<vmem>>, %arg4: memref<1x1x8xf32, #tpu.memory_space<vmem>>, %arg5: memref<1x1x8xf32, #tpu.memory_space<vmem>>) attributes {dimension_semantics = [#tpu.dimension_semantics<parallel>], iteration_bounds = array<i64: 1>, scalar_prefetch = 0 : i64, scratch_operands = 0 : i64, tpu.core_type = #tpu.core_type<tc>, window_params = [{transform_indices = @transform_0, window_bounds = array<i64: 128, 36>}, {pipeline_mode = #tpu.pipeline_mode<synchronous>, transform_indices = @transform_1, window_bounds = array<i64: 36, 8>}, {transform_indices = @transform_2, window_bounds = array<i64: 128, 8>}, {transform_indices = @transform_3, window_bounds = array<i64: 1, 1, 8>}, {transform_indices = @transform_4, window_bounds = array<i64: 1, 1, 8>}]} {
    %c0 = arith.constant 0 : index
    %c0_0 = arith.constant 0 : index
    %0 = vector.load %arg1[%c0, %c0_0] : memref<128x36xbf16, #tpu.memory_space<vmem>>, vector<128x36xbf16>
    %c0_1 = arith.constant 0 : index
    %c0_2 = arith.constant 0 : index
    %1 = vector.load %arg2[%c0_1, %c0_2] : memref<36x8xbf16, #tpu.memory_space<vmem>>, vector<36x8xbf16>
    %cst = arith.constant dense<0.000000e+00> : vector<128x8xf32>
    %2 = tpu.matmul %0, %1, %cst {dimension_numbers = #tpu.dot_dimension_numbers<[1], [0], [0], [1], [0, 0, 1, 1], [], []>} : vector<128x36xbf16>, vector<36x8xbf16>, vector<128x8xf32> -> vector<128x8xf32>
    %cst_3 = arith.constant dense<0.000000e+00> : vector<8xf32>
    %3 = vector.multi_reduction <add>, %2, %cst_3 [0] : vector<128x8xf32> to vector<8xf32>
    %4 = vector.shape_cast %3 : vector<8xf32> to vector<1x8xf32>
    %5 = vector.shape_cast %4 : vector<1x8xf32> to vector<1x1x8xf32>
    %c0_4 = arith.constant 0 : index
    %c0_5 = arith.constant 0 : index
    %c0_6 = arith.constant 0 : index
    %6 = vector.load %arg4[%c0_4, %c0_5, %c0_6] : memref<1x1x8xf32, #tpu.memory_space<vmem>>, vector<1x1x8xf32>
    tpu.vector_store %arg4[%c0_4, %c0_5, %c0_6], %5 {strides = array<i32>} : memref<1x1x8xf32, #tpu.memory_space<vmem>>, vector<1x1x8xf32>,
    %7 = arith.mulf %2, %2 : vector<128x8xf32>
    %cst_7 = arith.constant dense<0.000000e+00> : vector<8xf32>
    %8 = vector.multi_reduction <add>, %7, %cst_7 [0] : vector<128x8xf32> to vector<8xf32>
    %9 = vector.shape_cast %8 : vector<8xf32> to vector<1x8xf32>
    %10 = vector.shape_cast %9 : vector<1x8xf32> to vector<1x1x8xf32>
    %c0_8 = arith.constant 0 : index
    %c0_9 = arith.constant 0 : index
    %c0_10 = arith.constant 0 : index
    %11 = vector.load %arg5[%c0_8, %c0_9, %c0_10] : memref<1x1x8xf32, #tpu.memory_space<vmem>>, vector<1x1x8xf32>
    tpu.vector_store %arg5[%c0_8, %c0_9, %c0_10], %10 {strides = array<i32>} : memref<1x1x8xf32, #tpu.memory_space<vmem>>, vector<1x1x8xf32>,
    %12 = arith.truncf %2 : vector<128x8xf32> to vector<128x8xbf16>
    %c0_11 = arith.constant 0 : index
    %c0_12 = arith.constant 0 : index
    %13 = vector.load %arg3[%c0_11, %c0_12] : memref<128x8xbf16, #tpu.memory_space<vmem>>, vector<128x8xbf16>
    tpu.vector_store %arg3[%c0_11, %c0_12], %12 {strides = array<i32>} : memref<128x8xbf16, #tpu.memory_space<vmem>>, vector<128x8xbf16>,
    return
  }
  func.func @transform_0(%arg0: i32) -> (i32, i32) {
    %c0_i32 = arith.constant 0 : i32
    %c0_i32_0 = arith.constant 0 : i32
    return %arg0, %c0_i32 : i32, i32
  }
  func.func @transform_1(%arg0: i32) -> (i32, i32) {
    %c0_i32 = arith.constant 0 : i32
    %c0_i32_0 = arith.constant 0 : i32
    %c0_i32_1 = arith.constant 0 : i32
    return %c0_i32, %c0_i32_0 : i32, i32
  }
  func.func @transform_2(%arg0: i32) -> (i32, i32) {
    %c0_i32 = arith.constant 0 : i32
    %c0_i32_0 = arith.constant 0 : i32
    return %arg0, %c0_i32 : i32, i32
  }
  func.func @transform_3(%arg0: i32) -> (i32, i32, i32) {
    %c0_i32 = arith.constant 0 : i32
    %c0_i32_0 = arith.constant 0 : i32
    %c0_i32_1 = arith.constant 0 : i32
    return %arg0, %c0_i32, %c0_i32_0 : i32, i32, i32
  }
  func.func @transform_4(%arg0: i32) -> (i32, i32, i32) {
    %c0_i32 = arith.constant 0 : i32
    %c0_i32_0 = arith.constant 0 : i32
    %c0_i32_1 = arith.constant 0 : i32
    return %arg0, %c0_i32, %c0_i32_0 : i32, i32, i32
  }
}

module attributes {stable_mosaic.version = 11 : i64} {
  func.func @_conv_stats_kernel(%arg0: i32, %arg1: memref<128x128xbf16, #tpu.memory_space<vmem>>, %arg2: memref<128x128xbf16, #tpu.memory_space<vmem>>, %arg3: memref<128x128xbf16, #tpu.memory_space<vmem>>, %arg4: memref<1x1x128xf32, #tpu.memory_space<vmem>>, %arg5: memref<1x1x128xf32, #tpu.memory_space<vmem>>) attributes {dimension_semantics = [#tpu.dimension_semantics<parallel>], iteration_bounds = array<i64: 1>, scalar_prefetch = 0 : i64, scratch_operands = 0 : i64, tpu.core_type = #tpu.core_type<tc>, window_params = [{transform_indices = @transform_0, window_bounds = array<i64: 128, 128>}, {pipeline_mode = #tpu.pipeline_mode<synchronous>, transform_indices = @transform_1, window_bounds = array<i64: 128, 128>}, {transform_indices = @transform_2, window_bounds = array<i64: 128, 128>}, {transform_indices = @transform_3, window_bounds = array<i64: 1, 1, 128>}, {transform_indices = @transform_4, window_bounds = array<i64: 1, 1, 128>}]} {
    %c0 = arith.constant 0 : index
    %c0_0 = arith.constant 0 : index
    %0 = vector.load %arg1[%c0, %c0_0] : memref<128x128xbf16, #tpu.memory_space<vmem>>, vector<128x128xbf16>
    %c0_1 = arith.constant 0 : index
    %c0_2 = arith.constant 0 : index
    %1 = vector.load %arg2[%c0_1, %c0_2] : memref<128x128xbf16, #tpu.memory_space<vmem>>, vector<128x128xbf16>
    %cst = arith.constant dense<0.000000e+00> : vector<128x128xf32>
    %2 = tpu.matmul %0, %1, %cst {dimension_numbers = #tpu.dot_dimension_numbers<[1], [0], [0], [1], [0, 0, 1, 1], [], []>} : vector<128x128xbf16>, vector<128x128xbf16>, vector<128x128xf32> -> vector<128x128xf32>
    %cst_3 = arith.constant dense<0.000000e+00> : vector<128xf32>
    %3 = vector.multi_reduction <add>, %2, %cst_3 [0] : vector<128x128xf32> to vector<128xf32>
    %4 = vector.shape_cast %3 : vector<128xf32> to vector<1x128xf32>
    %5 = vector.shape_cast %4 : vector<1x128xf32> to vector<1x1x128xf32>
    %c0_4 = arith.constant 0 : index
    %c0_5 = arith.constant 0 : index
    %c0_6 = arith.constant 0 : index
    %6 = vector.load %arg4[%c0_4, %c0_5, %c0_6] : memref<1x1x128xf32, #tpu.memory_space<vmem>>, vector<1x1x128xf32>
    tpu.vector_store %arg4[%c0_4, %c0_5, %c0_6], %5 {strides = array<i32>} : memref<1x1x128xf32, #tpu.memory_space<vmem>>, vector<1x1x128xf32>,
    %7 = arith.mulf %2, %2 : vector<128x128xf32>
    %cst_7 = arith.constant dense<0.000000e+00> : vector<128xf32>
    %8 = vector.multi_reduction <add>, %7, %cst_7 [0] : vector<128x128xf32> to vector<128xf32>
    %9 = vector.shape_cast %8 : vector<128xf32> to vector<1x128xf32>
    %10 = vector.shape_cast %9 : vector<1x128xf32> to vector<1x1x128xf32>
    %c0_8 = arith.constant 0 : index
    %c0_9 = arith.constant 0 : index
    %c0_10 = arith.constant 0 : index
    %11 = vector.load %arg5[%c0_8, %c0_9, %c0_10] : memref<1x1x128xf32, #tpu.memory_space<vmem>>, vector<1x1x128xf32>
    tpu.vector_store %arg5[%c0_8, %c0_9, %c0_10], %10 {strides = array<i32>} : memref<1x1x128xf32, #tpu.memory_space<vmem>>, vector<1x1x128xf32>,
    %12 = arith.truncf %2 : vector<128x128xf32> to vector<128x128xbf16>
    %c0_11 = arith.constant 0 : index
    %c0_12 = arith.constant 0 : index
    %13 = vector.load %arg3[%c0_11, %c0_12] : memref<128x128xbf16, #tpu.memory_space<vmem>>, vector<128x128xbf16>
    tpu.vector_store %arg3[%c0_11, %c0_12], %12 {strides = array<i32>} : memref<128x128xbf16, #tpu.memory_space<vmem>>, vector<128x128xbf16>,
    return
  }
  func.func @transform_0(%arg0: i32) -> (i32, i32) {
    %c0_i32 = arith.constant 0 : i32
    %c0_i32_0 = arith.constant 0 : i32
    return %arg0, %c0_i32 : i32, i32
  }
  func.func @transform_1(%arg0: i32) -> (i32, i32) {
    %c0_i32 = arith.constant 0 : i32
    %c0_i32_0 = arith.constant 0 : i32
    %c0_i32_1 = arith.constant 0 : i32
    return %c0_i32, %c0_i32_0 : i32, i32
  }
  func.func @transform_2(%arg0: i32) -> (i32, i32) {
    %c0_i32 = arith.constant 0 : i32
    %c0_i32_0 = arith.constant 0 : i32
    return %arg0, %c0_i32 : i32, i32
  }
  func.func @transform_3(%arg0: i32) -> (i32, i32, i32) {
    %c0_i32 = arith.constant 0 : i32
    %c0_i32_0 = arith.constant 0 : i32
    %c0_i32_1 = arith.constant 0 : i32
    return %arg0, %c0_i32, %c0_i32_0 : i32, i32, i32
  }
  func.func @transform_4(%arg0: i32) -> (i32, i32, i32) {
    %c0_i32 = arith.constant 0 : i32
    %c0_i32_0 = arith.constant 0 : i32
    %c0_i32_1 = arith.constant 0 : i32
    return %arg0, %c0_i32, %c0_i32_0 : i32, i32, i32
  }
}

</mosaic_0001>

<bundles_post_ra>
// kernel: tpu_custom_call.1
= control target key start
LH: loop header
LB: loop body
LE: loop exit
PB: predicated region body
PF: predicated region fallthrough
CT: control target
= control target key end

     0   :  { %10 = vsyncpa [#allocation3], 0  ;;  %vm93_vm0 = vcmask 293888   ;;  %vm118_vm1 = vcmask 1041408   ;;  %s819_s0 = inlined_call_operand.vmem [shape: bf16[128,36], index: 0, kind: input, shape index: {}]   ;;  %s820_s1 = inlined_call_operand.vmem [shape: bf16[36,8], index: 1, kind: input, shape index: {}]   ;;  %s821_s2 = inlined_call_operand.vmem [shape: bf16[128,8], index: 2, kind: output, shape index: {0}]   ;;  %s822_s3 = inlined_call_operand.hbm [shape: f32[1,1,8], index: 3, kind: output, shape index: {1}]   ;;  %s823_s4 = inlined_call_operand.hbm [shape: f32[1,1,8], index: 4, kind: output, shape index: {2}]  }
   0x1   :  { %v520_v0 = vld [vmem:[%s820_s1] sm:$0xff]   ;;  %v521_v1 = vld [vmem:[%s820_s1 + $0x8] sm:$0xff]   ;;  %v522_v2 = vld [vmem:[%s820_s1 + $0x10] ss:$0 sps:$4 sm:$0x33]  }
   0x2   :  { %488 = vmatprep.subr.bf16.mxu0 %v520_v0  ;;  %v523_v3 = vld [vmem:[%s819_s0] sm:$0xff]   ;;  %510 = vmatprep.subr.bf16.mxu1 %v520_v0  ;;  %v120_v5 = vsel %vm118_vm1, %v522_v2, 0  ;;  %v524_v6 = vld [vmem:[%s819_s0 + $0x8] sm:$0xff]  }
   0x3   :  { %489 = vmatpush3.bf16.msra.mxu0 %v520_v0  ;;  %513 = vmatpush3.bf16.msra.mxu1 %v520_v0  ;;  %v527_v4 = vld [vmem:[%s819_s0 + $0x20] sm:$0xff]   ;;  %v528_v7 = vld [vmem:[%s819_s0 + $0x28] sm:$0xff]  }
   0x4   :  { %490 = vmatprep.subr.bf16.mxu0 %v521_v1  ;;  %494 = vmatprep.mubr.msk.bf16.mxu0 %vm93_vm0, %v523_v3 }
   0x5   :  { %511 = vmatprep.subr.bf16.mxu1 %v521_v1  ;;  %502 = vmatprep.mubr.msk.bf16.mxu1 %vm93_vm0, %v527_v4 }
   0x7   :  { %491 = vmatpush3.bf16.msra.mxu0 %v521_v1  ;;  %514 = vmatpush3.bf16.msra.mxu1 %v521_v1 }
   0x8   :  { %516 = vmatprep.subr.msk.bf16.mxu0 %vm118_vm1, %v522_v2  ;;  %517 = vmatprep.subr.msk.bf16.mxu1 %vm118_vm1, %v522_v2 }
   0x9   :  { %11 = vsyncpa [#allocation5], 0  ;;  %v525_v8 = vld [vmem:[%s819_s0 + $0x10] sm:$0xff]   ;;  %v526_v10 = vld [vmem:[%s819_s0 + $0x18] sm:$0xff]   ;;  %vm377_vm2 = vcmask 60416   ;;  %vm219_vm3 = vcmask 64512  }
   0xa   :  { %v529_v9 = vld [vmem:[%s819_s0 + $0x30] sm:$0xff]   ;;  %v530_v11 = vld [vmem:[%s819_s0 + $0x38] sm:$0xff]   ;;  %vm257_vm4 = vcmask 57344   ;;  %s580_s14 = smov [#allocation4]  }
   0xb   :  { %493 = vmatpush3.bf16.msra.mxu0 %v120_v5  ;;  %515 = vmatpush3.bf16.msra.mxu1 %v120_v5  ;;  %s412_s15 = sshll.u32 %s580_s14, 4  ;;  %s786_s15 = int_to_ptr.vmem [resolvable:$true] %s412_s15 }
   0xe   :  { %495 = vmatmul.mubr.msk.bf16.vlgmr.msra.gmra.mrb[0].mxu0 %vm93_vm0, %v524_v6  ;;  %503 = vmatmul.mubr.msk.bf16.vlgmr.msra.gmra.mrb[0].mxu1 %vm93_vm0, %v528_v7 }
   0xf   :  { %498 = vmatprep.mubr.msk.bf16.mxu0 %vm93_vm0, %v525_v8  ;;  %506 = vmatprep.mubr.msk.bf16.mxu1 %vm93_vm0, %v529_v9 }
  0x16   :  { %499 = vmatmul.mubr.msk.bf16.gmra.mrb[4].mxu0 %vm93_vm0, %v526_v10  ;;  %507 = vmatmul.mubr.msk.bf16.gmra.mrb[4].mxu1 %vm93_vm0, %v530_v11 }
  0xe1   :  { %v496_v12 = vpop.f32.mrb[0].mxu0  ;;  %v647_v13 = vpop.f32.mrb[0].mxu1 }
  0xe2   :  { %v463_v14 = vpack.c.bf16 %v496_v12, %v496_v12  ;;  %v156_v15 = vpop.f32.mrb[1].mxu0  ;;  %v649_v16 = vpop.f32.mrb[1].mxu1  ;;  %v261_v21 = vmul.f32 %v496_v12, %v496_v12  ;;  %v471_v31 = vpack.c.bf16 %v647_v13, %v647_v13  ;;  %v223_v32 = vsel %vm219_vm3, %v496_v12, 0.0 }
  0xe3   :  { %v259_v17 = vmul.f32 %v156_v15, %v156_v15  ;;  %v461_v18 = vpack.c.bf16 %v156_v15, %v156_v15  ;;  %v497_v19 = vpop.f32.mrb[2].mxu0  ;;  %v651_v20 = vpop.f32.mrb[2].mxu1  ;;  %v220_v25 = vsel %vm219_vm3, %v156_v15, 0.0  ;;  %v469_v35 = vpack.c.bf16 %v649_v16, %v649_v16 }
  0xe4   :  { %380 = vst.msk [vmem:[%s821_s2 + $0x8] sm:$0xf] %vm377_vm2, %v463_v14  ;;  %v464_v22 = vpack.c.bf16 %v497_v19, %v497_v19  ;;  %v159_v23 = vpop.f32.mrb[3].mxu0  ;;  %v657_v24 = vpop.f32.mrb[3].mxu1  ;;  %v262_v29 = vmul.f32 %v497_v19, %v497_v19  ;;  %388 = vst.msk [vmem:[%s821_s2 + $0x28] sm:$0xf] %vm377_vm2, %v471_v31  ;;  %v472_v40 = vpack.c.bf16 %v651_v20, %v651_v20 }
  0xe5   :  { %378 = vst.msk [vmem:[%s821_s2] sm:$0xf] %vm377_vm2, %v461_v18  ;;  %v221_v26 = vsel %vm219_vm3, %v159_v23, 0.0  ;;  %v260_v27 = vmul.f32 %v159_v23, %v159_v23  ;;  %v462_v28 = vpack.c.bf16 %v159_v23, %v159_v23  ;;  %v275_v33 = vsel %vm219_vm3, %v259_v17, 0.0  ;;  %386 = vst.msk [vmem:[%s821_s2 + $0x20] sm:$0xf] %vm377_vm2, %v469_v35 }
  0xe6   :  { %381 = vst.msk [vmem:[%s821_s2 + $0xc] sm:$0xf] %vm377_vm2, %v464_v22  ;;  %v222_v30 = vadd.f32 %v221_v26, %v220_v25  ;;  %v278_v38 = vsel %vm219_vm3, %v261_v21, 0.0  ;;  %v225_v42 = vsel %vm219_vm3, %v497_v19, 0.0  ;;  %v280_v43 = vsel %vm219_vm3, %v262_v29, 0.0 }
  0xe7   :  { %v276_v34 = vsel %vm219_vm3, %v260_v27, 0.0  ;;  %379 = vst.msk [vmem:[%s821_s2 + $0x4] sm:$0xf] %vm377_vm2, %v462_v28  ;;  %389 = vst.msk [vmem:[%s821_s2 + $0x2c] sm:$0xf] %vm377_vm2, %v472_v40  ;;  %v267_v2 = vmul.f32 %v649_v16, %v649_v16  ;;  %v470_v3 = vpack.c.bf16 %v657_v24, %v657_v24  ;;  %v235_v12 = vsel %vm219_vm3, %v649_v16, 0.0 }
  0xe8   :  { %v224_v36 = vadd.f32 %v223_v32, %v222_v30  ;;  %v277_v37 = vadd.f32 %v276_v34, %v275_v33  ;;  %v268_v22 = vmul.f32 %v657_v24, %v657_v24  ;;  %v269_v26 = vmul.f32 %v647_v13, %v647_v13 }
  0xe9   :  { %v500_v39 = vpop.f32.mrb[4].mxu0  ;;  %v691_v41 = vpop.f32.mrb[4].mxu1  ;;  %387 = vst.msk [vmem:[%s821_s2 + $0x24] sm:$0xf] %vm377_vm2, %v470_v3  ;;  %v290_v21 = vsel %vm219_vm3, %v267_v2, 0.0  ;;  %v237_v27 = vsel %vm219_vm3, %v657_v24, 0.0  ;;  %v270_v31 = vmul.f32 %v651_v20, %v651_v20 }
  0xea   :  { %v279_v44 = vadd.f32 %v278_v38, %v277_v37  ;;  %v467_v45 = vpack.c.bf16 %v500_v39, %v500_v39  ;;  %v172_v46 = vpop.f32.mrb[5].mxu0  ;;  %v204_v47 = vpop.f32.mrb[5].mxu1  ;;  %v226_v48 = vadd.f32 %v225_v42, %v224_v36  ;;  %v265_v61 = vmul.f32 %v500_v39, %v500_v39 }
  0xeb   :  { %v227_v49 = vsel %vm219_vm3, %v172_v46, 0.0  ;;  %v263_v50 = vmul.f32 %v172_v46, %v172_v46  ;;  %v465_v51 = vpack.c.bf16 %v172_v46, %v172_v46  ;;  %v501_v52 = vpop.f32.mrb[6].mxu0  ;;  %v700_v53 = vpop.f32.mrb[6].mxu1  ;;  %v231_v4 = vsel %vm219_vm3, %v500_v39, 0.0 }
  0xec   :  { %384 = vst.msk [vmem:[%s821_s2 + $0x18] sm:$0xf] %vm377_vm2, %v467_v45  ;;  %v281_v54 = vadd.f32 %v280_v43, %v279_v44  ;;  %v175_v55 = vpop.f32.mrb[7].mxu0  ;;  %v207_v56 = vpop.f32.mrb[7].mxu1  ;;  %v228_v57 = vadd.f32 %v227_v49, %v226_v48  ;;  %v468_v59 = vpack.c.bf16 %v501_v52, %v501_v52  ;;  %v266_v5 = vmul.f32 %v501_v52, %v501_v52 }
  0xed   :  { %v282_v58 = vsel %vm219_vm3, %v263_v50, 0.0  ;;  %382 = vst.msk [vmem:[%s821_s2 + $0x10] sm:$0xf] %vm377_vm2, %v465_v51  ;;  %v229_v60 = vsel %vm219_vm3, %v175_v55, 0.0  ;;  %v264_v63 = vmul.f32 %v175_v55, %v175_v55  ;;  %v466_v0 = vpack.c.bf16 %v175_v55, %v175_v55 }
  0xee   :  { %v283_v62 = vadd.f32 %v282_v58, %v281_v54  ;;  %385 = vst.msk [vmem:[%s821_s2 + $0x1c] sm:$0xf] %vm377_vm2, %v468_v59  ;;  %v230_v1 = vadd.f32 %v229_v60, %v228_v57  ;;  %v475_v7 = vpack.c.bf16 %v691_v41, %v691_v41  ;;  %v286_v10 = vsel %vm219_vm3, %v265_v61, 0.0 }
  0xef   :  { %v284_v6 = vsel %vm219_vm3, %v264_v63, 0.0  ;;  %383 = vst.msk [vmem:[%s821_s2 + $0x14] sm:$0xf] %vm377_vm2, %v466_v0  ;;  %v233_v11 = vsel %vm219_vm3, %v501_v52, 0.0  ;;  %v473_v14 = vpack.c.bf16 %v204_v47, %v204_v47  ;;  %v476_v18 = vpack.c.bf16 %v700_v53, %v700_v53 }
  0xf0   :  { %v232_v8 = vadd.f32 %v231_v4, %v230_v1  ;;  %v285_v9 = vadd.f32 %v284_v6, %v283_v62  ;;  %392 = vst.msk [vmem:[%s821_s2 + $0x38] sm:$0xf] %vm377_vm2, %v475_v7  ;;  %v288_v19 = vsel %vm219_vm3, %v266_v5, 0.0  ;;  %v474_v16 = vpack.c.bf16 %v207_v56, %v207_v56 }
  0xf1   :  { %390 = vst.msk [vmem:[%s821_s2 + $0x30] sm:$0xf] %vm377_vm2, %v473_v14  ;;  %393 = vst.msk [vmem:[%s821_s2 + $0x3c] sm:$0xf] %vm377_vm2, %v476_v18  ;;  %v239_v30 = vsel %vm219_vm3, %v647_v13, 0.0  ;;  %v292_v32 = vsel %vm219_vm3, %v268_v22, 0.0  ;;  %v271_v33 = vmul.f32 %v204_v47, %v204_v47  ;;  %v272_v42 = vmul.f32 %v207_v56, %v207_v56 }
  0xf2   :  { %v287_v15 = vadd.f32 %v286_v10, %v285_v9  ;;  %v234_v17 = vadd.f32 %v233_v11, %v232_v8  ;;  %391 = vst.msk [vmem:[%s821_s2 + $0x34] sm:$0xf] %vm377_vm2, %v474_v16  ;;  %v294_v24 = vsel %vm219_vm3, %v269_v26, 0.0  ;;  %v241_v36 = vsel %vm219_vm3, %v651_v20, 0.0  ;;  %s579_s2 = smov [#allocation2]  }
  0xf3   :  { %v243_v37 = vsel %vm219_vm3, %v204_v47, 0.0  ;;  %v296_v40 = vsel %vm219_vm3, %v270_v31, 0.0  ;;  %v298_v13 = vsel %vm219_vm3, %v271_v33, 0.0  ;;  %v273_v45 = vmul.f32 %v691_v41, %v691_v41  ;;  %s402_s13 = sshll.u32 %s579_s2, 4  ;;  %s403_s13 = int_to_ptr.vmem [resolvable:$true] %s402_s13 }
  0xf4   :  { %v236_v23 = vadd.f32 %v235_v12, %v234_v17  ;;  %v289_v25 = vadd.f32 %v288_v19, %v287_v15  ;;  %v245_v46 = vsel %vm219_vm3, %v207_v56, 0.0  ;;  %v247_v20 = vsel %vm219_vm3, %v691_v41, 0.0  ;;  %s531_s16 = scalar_lea.vmem %s403_s13, 16  ;;  %s535_s17 = scalar_lea.vmem %s403_s13, 32 }
  0xf5   :  { %v274_v47 = vmul.f32 %v700_v53, %v700_v53  ;;  %v300_v50 = vsel %vm219_vm3, %v272_v42, 0.0  ;;  %v302_v54 = vsel %vm219_vm3, %v273_v45, 0.0  ;;  %v249_v55 = vsel %vm219_vm3, %v700_v53, 0.0  ;;  %p532_p0 = scmp.ne.s32.totalorder %s403_s13, %s531_s16  ;;  %p536_p1 = scmp.lt.s32.totalorder %s403_s13, %s403_s13 }
  0xf6   :  { %v291_v28 = vadd.f32 %v290_v21, %v289_v25  ;;  %v238_v29 = vadd.f32 %v237_v27, %v236_v23  ;;  %p537_p2 = scmp.lt.s32.totalorder %s535_s17, %s531_s16 }
  0xf7   :  { %v304_v56 = vsel %vm219_vm3, %v274_v47, 0.0 }
  0xf8   :  { %v240_v34 = vadd.f32 %v239_v30, %v238_v29  ;;  %v293_v35 = vadd.f32 %v292_v32, %v291_v28  ;;  %p538_p3 = por %p537_p2, %p536_p1 }
  0xfa   :  { %v295_v38 = vadd.f32 %v294_v24, %v293_v35  ;;  %v242_v39 = vadd.f32 %v241_v36, %v240_v34  ;;  %p539_p4 = pnand %p538_p3, %p532_p0 }
  0xfc   :  { %v244_v43 = vadd.f32 %v243_v37, %v242_v39  ;;  %v297_v44 = vadd.f32 %v296_v40, %v295_v38 }
  0xfe   :  { %v299_v48 = vadd.f32 %v298_v13, %v297_v44  ;;  %v246_v49 = vadd.f32 %v245_v46, %v244_v43 }
 0x100   :  { %v248_v51 = vadd.f32 %v247_v20, %v246_v49  ;;  %v301_v52 = vadd.f32 %v300_v50, %v299_v48 }
 0x102   :  { %v250_v57 = vadd.f32 %v249_v55, %v248_v51  ;;  %v303_v58 = vadd.f32 %v302_v54, %v301_v52 }
 0x104   :  { %v305_v59 = vadd.f32 %v304_v56, %v303_v58  ;;  %v251_v60 = vrot.slane %v250_v57, 4 }
 0x106   :  { %v252_v61 = vadd.f32 %v251_v60, %v250_v57  ;;  %v306_v41 = vrot.slane %v305_v59, 4 }
 0x108   :  { %v253_v62 = vrot.slane %v252_v61, 2  ;;  %v307_v63 = vadd.f32 %v306_v41, %v305_v59 }
 0x10a   :  { %v254_v0 = vadd.f32 %v253_v62, %v252_v61  ;;  %v308_v1 = vrot.slane %v307_v63, 2 }
 0x10c   :  { %v255_v2 = vrot.slane %v254_v0, 1  ;;  %v309_v3 = vadd.f32 %v308_v1, %v307_v63 }
 0x10e   :  { %v256_v53 = vadd.f32 %v255_v2, %v254_v0  ;;  %v310_v4 = vrot.slane %v309_v3, 1 }
 0x110   :  { %258 = vst.msk [vmem:[#allocation2] sm:$0x1] %vm257_vm4, %v256_v53  ;;  %v311_v5 = vadd.f32 %v310_v4, %v309_v3 }
 0x111   :  { %542 = shalt.err (!%p539_p4)
}
 0x112   :  { %s543_s20 = scalar_lea.hbm %s822_s3, 16 }
 0x113   :  { %p544_p5 = scmp.ne.s32.totalorder %s822_s3, %s543_s20  ;;  %p547_p6 = scmp.lt.u32.totalorder %s543_s20, %s822_s3 }
 0x115   :  { %p549_p7 = pnand %p547_p6, %p544_p5 }
 0x117   :  { %552 = shalt.err (!%p549_p7)
}
 0x118   :  { %405 = dma.vmem_to_hbm [thread:$0]  %s403_s13, 16, %s822_s3, [#allocation3]   ;;  %312 = vst.msk [vmem:[#allocation4] sm:$0x1] %vm257_vm4, %v311_v5 }
 0x119   :  { %s553_s26 = scalar_lea.vmem %s786_s15, 16  ;;  %s557_s27 = scalar_lea.vmem %s786_s15, 32 }
 0x11a   :  { %p554_p8 = scmp.ne.s32.totalorder %s786_s15, %s553_s26  ;;  %p558_p9 = scmp.lt.s32.totalorder %s786_s15, %s786_s15 }
 0x11b   :  { %p559_p10 = scmp.lt.s32.totalorder %s557_s27, %s553_s26 }
 0x11d   :  { %p560_p11 = por %p559_p10, %p558_p9 }
 0x11f   :  { %p561_p12 = pnand %p560_p11, %p554_p8 }
 0x121   :  { %564 = shalt.err (!%p561_p12)
}
 0x122   :  { %s565_s30 = scalar_lea.hbm %s823_s4, 16 }
 0x123   :  { %p566_p13 = scmp.ne.s32.totalorder %s823_s4, %s565_s30  ;;  %p569_p0 = scmp.lt.u32.totalorder %s565_s30, %s823_s4 }
 0x125   :  { %p571_p1 = pnand %p569_p0, %p566_p13 }
 0x127   :  { %574 = shalt.err (!%p571_p1)
}
 0x128   :  { %415 = dma.vmem_to_hbm [thread:$0]  %s786_s15, 16, %s823_s4, [#allocation5]  }
 0x129   :  { %575 = dma.done.wait [#allocation3], 16  }
 0x12a   :  { %576 = vsyncadd [#allocation3], 4294967280 }
 0x12b   :  { %577 = dma.done.wait [#allocation5], 16  }
 0x12c   :  { %578 = vsyncadd [#allocation5], 4294967280 }
 0x12d   :  { %424 = vsyncpa [#allocation3], 1 }
 0x12e   :  { %425 = vsyncpa [#allocation5], 1 }

// kernel: tpu_custom_call.1
= control target key start
LH: loop header
LB: loop body
LE: loop exit
PB: predicated region body
PF: predicated region fallthrough
CT: control target
= control target key end

     0   :  { %10 = vsyncpa [#allocation3], 0  ;;  %s888_s0 = inlined_call_operand.hbm [shape: bf16[128,128], index: 0, kind: input, shape index: {}]   ;;  %s889_s1 = inlined_call_operand.hbm [shape: bf16[128,128], index: 1, kind: input, shape index: {}]   ;;  %s890_s2 = inlined_call_operand.hbm [shape: bf16[128,128], index: 2, kind: output, shape index: {0}]   ;;  %s891_s3 = inlined_call_operand.hbm [shape: f32[1,1,128], index: 3, kind: output, shape index: {1}]   ;;  %s892_s4 = inlined_call_operand.hbm [shape: f32[1,1,128], index: 4, kind: output, shape index: {2}]  }
   0x1   :  { %11 = vsyncpa [#allocation6], 0 }
   0x2   :  { %12 = vsyncpa [#allocation4], 0 }
   0x3   :  { %13 = vsyncpa [#allocation9], 0  ;;  %s755_s15 = smov [#allocation2]   ;;  %s637_s19 = scalar_lea.hbm %s888_s0, 1024 }
   0x4   :  { %s19_s16 = sshll.u32 %s755_s15, 4  ;;  %p638_p0 = scmp.ne.s32.totalorder %s888_s0, %s637_s19  ;;  %s20_s16 = int_to_ptr.vmem [resolvable:$true] %s19_s16 }
   0x5   :  { %p641_p1 = scmp.lt.u32.totalorder %s637_s19, %s888_s0 }
   0x7   :  { %p643_p2 = pnand %p641_p1, %p638_p0 }
   0x9   :  { %646 = shalt.err (!%p643_p2)
}
   0xa   :  { %s647_s24 = scalar_lea.vmem %s20_s16, 1024  ;;  %p652_p4 = scmp.lt.s32.totalorder %s20_s16, %s20_s16 }
   0xb   :  { %p648_p3 = scmp.ne.s32.totalorder %s20_s16, %s647_s24  ;;  %p653_p5 = scmp.lt.s32.totalorder %s647_s24, %s647_s24 }
   0xd   :  { %p654_p6 = por %p653_p5, %p652_p4 }
   0xf   :  { %p655_p7 = pnand %p654_p6, %p648_p3 }
  0x11   :  { %658 = shalt.err (!%p655_p7)
}
  0x12   :  { %s756_s25 = smov 64   ;;  %s757_s26 = smov 4  }
  0x13   :  { %25 = dma.hbm_to_vmem [thread:$0]  %s888_s0, 1024, %s20_s16, [#allocation3], %s756_s25, %s756_s25, %s757_s26  }
  0x14   :  { %s758_s29 = smov [#allocation5]   ;;  %s659_s7 = scalar_lea.hbm %s889_s1, 1024 }
  0x15   :  { %s31_s30 = sshll.u32 %s758_s29, 4  ;;  %p660_p8 = scmp.ne.s32.totalorder %s889_s1, %s659_s7  ;;  %s32_s30 = int_to_ptr.vmem [resolvable:$true] %s31_s30 }
  0x16   :  { %p663_p9 = scmp.lt.u32.totalorder %s659_s7, %s889_s1 }
  0x18   :  { %p665_p10 = pnand %p663_p9, %p660_p8 }
  0x1a   :  { %668 = shalt.err (!%p665_p10)
}
  0x1b   :  { %s669_s12 = scalar_lea.vmem %s32_s30, 1024  ;;  %p674_p12 = scmp.lt.s32.totalorder %s32_s30, %s32_s30 }
  0x1c   :  { %p670_p11 = scmp.ne.s32.totalorder %s32_s30, %s669_s12  ;;  %p675_p13 = scmp.lt.s32.totalorder %s669_s12, %s669_s12 }
  0x1e   :  { %p676_p0 = por %p675_p13, %p674_p12 }
  0x20   :  { %p677_p1 = pnand %p676_p0, %p670_p11 }
  0x22   :  { %680 = shalt.err (!%p677_p1)
}
  0x23   :  { %37 = dma.hbm_to_vmem [thread:$0]  %s889_s1, 1024, %s32_s30, [#allocation6], %s756_s25, %s756_s25, %s757_s26  }
  0x24   :  { %747 = dma.done.wait [#allocation3], 1024  }
  0x25   :  { %748 = vsyncadd [#allocation3], 4294966272 }
  0x26   :  { %749 = dma.done.wait [#allocation6], 1024  }
  0x27   :  { %750 = vsyncadd [#allocation6], 4294966272  ;;  %v621_v0 = vld [vmem:[#allocation5] sm:$0xff]   ;;  %v622_v1 = vld [vmem:[#allocation5 + $0x8] sm:$0xff]   ;;  %s759_s1 = smov [#allocation7]  }
  0x28   :  { %566 = vmatprep.subr.bf16.mxu0 %v621_v0  ;;  %598 = vmatprep.subr.bf16.mxu1 %v621_v0  ;;  %v623_v2 = vld [vmem:[#allocation5 + $0x10] sm:$0xff]   ;;  %v624_v3 = vld [vmem:[#allocation5 + $0x18] sm:$0xff]   ;;  %v629_v4 = vld [vmem:[#allocation2] sm:$0xff]   ;;  %s415_s14 = sshll.u32 %s759_s1, 4  ;;  %s416_s14 = int_to_ptr.vmem [resolvable:$true] %s415_s14 }
  0x29   :  { %567 = vmatpush3.bf16.msra.mxu0 %v621_v0  ;;  %606 = vmatpush3.bf16.msra.mxu1 %v621_v0  ;;  %v625_v5 = vld [vmem:[#allocation5 + $0x20] sm:$0xff]   ;;  %v626_v7 = vld [vmem:[#allocation5 + $0x28] sm:$0xff]   ;;  %v627_v8 = vld [vmem:[#allocation5 + $0x30] sm:$0xff]   ;;  %s681_s15 = scalar_lea.vmem %s416_s14, 1024  ;;  %p686_p3 = scmp.lt.s32.totalorder %s416_s14, %s416_s14 }
  0x2a   :  { %568 = vmatprep.subr.bf16.mxu0 %v622_v1  ;;  %599 = vmatprep.subr.bf16.mxu1 %v622_v1  ;;  %v633_v6 = vld [vmem:[#allocation2 + $0x20] sm:$0xff]   ;;  %v628_v9 = vld [vmem:[#allocation5 + $0x38] sm:$0xff]   ;;  %v630_v10 = vld [vmem:[#allocation2 + $0x8] sm:$0xff]   ;;  %p682_p2 = scmp.ne.s32.totalorder %s416_s14, %s681_s15  ;;  %p687_p4 = scmp.lt.s32.totalorder %s681_s15, %s681_s15 }
  0x2b   :  { %582 = vmatprep.mubr.bf16.mxu0 %v629_v4  ;;  %590 = vmatprep.mubr.bf16.mxu1 %v633_v6  ;;  %v634_v11 = vld [vmem:[#allocation2 + $0x28] sm:$0xff]   ;;  %v631_v12 = vld [vmem:[#allocation2 + $0x10] sm:$0xff]   ;;  %v632_v14 = vld [vmem:[#allocation2 + $0x18] sm:$0xff]  }
  0x2c   :  { %v635_v13 = vld [vmem:[#allocation2 + $0x30] sm:$0xff]   ;;  %v636_v15 = vld [vmem:[#allocation2 + $0x38] sm:$0xff]   ;;  %p688_p5 = por %p687_p4, %p686_p3 }
  0x2d   :  { %569 = vmatpush3.bf16.msra.mxu0 %v622_v1  ;;  %607 = vmatpush3.bf16.msra.mxu1 %v622_v1 }
  0x2e   :  { %570 = vmatprep.subr.bf16.mxu0 %v623_v2  ;;  %600 = vmatprep.subr.bf16.mxu1 %v623_v2  ;;  %p689_p6 = pnand %p688_p5, %p682_p2 }
  0x31   :  { %571 = vmatpush3.bf16.msra.mxu0 %v623_v2  ;;  %608 = vmatpush3.bf16.msra.mxu1 %v623_v2 }
  0x32   :  { %572 = vmatprep.subr.bf16.mxu0 %v624_v3  ;;  %601 = vmatprep.subr.bf16.mxu1 %v624_v3 }
  0x35   :  { %573 = vmatpush3.bf16.msra.mxu0 %v624_v3  ;;  %609 = vmatpush3.bf16.msra.mxu1 %v624_v3 }
  0x36   :  { %574 = vmatprep.subr.bf16.mxu0 %v625_v5  ;;  %602 = vmatprep.subr.bf16.mxu1 %v625_v5 }
  0x39   :  { %575 = vmatpush3.bf16.msra.mxu0 %v625_v5  ;;  %610 = vmatpush3.bf16.msra.mxu1 %v625_v5 }
  0x3a   :  { %576 = vmatprep.subr.bf16.mxu0 %v626_v7  ;;  %603 = vmatprep.subr.bf16.mxu1 %v626_v7 }
  0x3d   :  { %577 = vmatpush3.bf16.msra.mxu0 %v626_v7  ;;  %611 = vmatpush3.bf16.msra.mxu1 %v626_v7 }
  0x3e   :  { %578 = vmatprep.subr.bf16.mxu0 %v627_v8  ;;  %604 = vmatprep.subr.bf16.mxu1 %v627_v8 }
  0x41   :  { %579 = vmatpush3.bf16.msra.mxu0 %v627_v8  ;;  %612 = vmatpush3.bf16.msra.mxu1 %v627_v8 }
  0x42   :  { %580 = vmatprep.subr.bf16.mxu0 %v628_v9  ;;  %605 = vmatprep.subr.bf16.mxu1 %v628_v9 }
  0x45   :  { %581 = vmatpush3.bf16.msra.mxu0 %v628_v9  ;;  %613 = vmatpush3.bf16.msra.mxu1 %v628_v9 }
  0x48   :  { %583 = vmatmul.mubr.bf16.vlgmr.msra.gmra.mrb[0].mxu0 %v630_v10  ;;  %591 = vmatmul.mubr.bf16.vlgmr.msra.gmra.mrb[0].mxu1 %v634_v11 }
  0x49   :  { %586 = vmatprep.mubr.bf16.mxu0 %v631_v12  ;;  %594 = vmatprep.mubr.bf16.mxu1 %v635_v13 }
  0x50   :  { %587 = vmatmul.mubr.bf16.gmra.mrb[4].mxu0 %v632_v14  ;;  %595 = vmatmul.mubr.bf16.gmra.mrb[4].mxu1 %v636_v15 }
 0x11b   :  { %v584_v16 = vpop.f32.mrb[0].mxu0  ;;  %v817_v17 = vpop.f32.mrb[0].mxu1 }
 0x11c   :  { %v207_v18 = vpop.f32.mrb[1].mxu0  ;;  %v819_v19 = vpop.f32.mrb[1].mxu1  ;;  %v294_v31 = vmul.f32 %v584_v16, %v584_v16 }
 0x11d   :  { %v585_v20 = vpop.f32.mrb[2].mxu0  ;;  %v821_v21 = vpop.f32.mrb[2].mxu1  ;;  %v292_v26 = vmul.f32 %v207_v18, %v207_v18  ;;  %v300_v61 = vmul.f32 %v819_v19, %v819_v19 }
 0x11e   :  { %v511_v22 = vpack.c.bf16 %v585_v20, %v584_v16  ;;  %v210_v23 = vpop.f32.mrb[3].mxu0  ;;  %v531_v24 = vpack.c.bf16 %v821_v21, %v817_v17  ;;  %v825_v25 = vpop.f32.mrb[3].mxu1  ;;  %v295_v34 = vmul.f32 %v585_v20, %v585_v20 }
 0x11f   :  { %v270_v27 = vadd.f32 %v210_v23, %v207_v18  ;;  %v293_v28 = vmul.f32 %v210_v23, %v210_v23  ;;  %v506_v29 = vpack.c.bf16 %v210_v23, %v207_v18  ;;  %v526_v30 = vpack.c.bf16 %v825_v25, %v819_v19 }
 0x120   :  { %543 = vst [vmem:[#allocation7 + $0x8] sm:$0xff] %v511_v22   ;;  %547 = vst [vmem:[#allocation7 + $0x28] sm:$0xff] %v531_v24  }
 0x121   :  { %v271_v32 = vadd.f32 %v584_v16, %v270_v27  ;;  %v308_v33 = vadd.f32 %v293_v28, %v292_v26  ;;  %507 = vst [vmem:[#allocation7] sm:$0xff] %v506_v29   ;;  %546 = vst [vmem:[#allocation7 + $0x20] sm:$0xff] %v526_v30  }
 0x123   :  { %v309_v35 = vadd.f32 %v308_v33, %v294_v31  ;;  %v588_v36 = vpop.f32.mrb[4].mxu0  ;;  %v272_v37 = vadd.f32 %v585_v20, %v271_v32  ;;  %v596_v38 = vpop.f32.mrb[4].mxu1 }
 0x124   :  { %v223_v39 = vpop.f32.mrb[5].mxu0  ;;  %v255_v40 = vpop.f32.mrb[5].mxu1  ;;  %v298_v55 = vmul.f32 %v588_v36, %v588_v36 }
 0x125   :  { %v273_v41 = vadd.f32 %v272_v37, %v223_v39  ;;  %v296_v42 = vmul.f32 %v223_v39, %v223_v39  ;;  %v310_v43 = vadd.f32 %v309_v35, %v295_v34  ;;  %v589_v44 = vpop.f32.mrb[6].mxu0  ;;  %v597_v45 = vpop.f32.mrb[6].mxu1 }
 0x126   :  { %v521_v46 = vpack.c.bf16 %v589_v44, %v588_v36  ;;  %v226_v47 = vpop.f32.mrb[7].mxu0  ;;  %v541_v48 = vpack.c.bf16 %v597_v45, %v596_v38  ;;  %v258_v49 = vpop.f32.mrb[7].mxu1  ;;  %v299_v58 = vmul.f32 %v589_v44, %v589_v44 }
 0x127   :  { %v311_v50 = vadd.f32 %v310_v43, %v296_v42  ;;  %v274_v51 = vadd.f32 %v273_v41, %v226_v47  ;;  %v297_v52 = vmul.f32 %v226_v47, %v226_v47  ;;  %v516_v53 = vpack.c.bf16 %v226_v47, %v223_v39 }
 0x128   :  { %545 = vst [vmem:[#allocation7 + $0x18] sm:$0xff] %v521_v46   ;;  %549 = vst [vmem:[#allocation7 + $0x38] sm:$0xff] %v541_v48   ;;  %v536_v54 = vpack.c.bf16 %v258_v49, %v255_v40 }
 0x129   :  { %v275_v56 = vadd.f32 %v588_v36, %v274_v51  ;;  %v312_v57 = vadd.f32 %v311_v50, %v297_v52  ;;  %544 = vst [vmem:[#allocation7 + $0x10] sm:$0xff] %v516_v53  }
 0x12a   :  { %548 = vst [vmem:[#allocation7 + $0x30] sm:$0xff] %v536_v54  }
 0x12b   :  { %v313_v59 = vadd.f32 %v312_v57, %v298_v55  ;;  %v276_v60 = vadd.f32 %v589_v44, %v275_v56 }
 0x12c   :  { %692 = shalt.err (!%p689_p6)
}
 0x12d   :  { %s693_s18 = scalar_lea.hbm %s890_s2, 1024 }
 0x12e   :  { %p694_p7 = scmp.ne.s32.totalorder %s890_s2, %s693_s18  ;;  %p697_p8 = scmp.lt.u32.totalorder %s693_s18, %s890_s2 }
 0x130   :  { %p699_p9 = pnand %p697_p8, %p694_p7 }
 0x132   :  { %702 = shalt.err (!%p699_p9)
}
 0x133   :  { %421 = dma.vmem_to_hbm [thread:$0]  %s416_s14, 1024, %s890_s2, [#allocation4], %s756_s25, %s756_s25, %s757_s26   ;;  %v277_v62 = vadd.f32 %v276_v60, %v819_v19  ;;  %v314_v63 = vadd.f32 %v313_v59, %v299_v58  ;;  %v301_v2 = vmul.f32 %v825_v25, %v825_v25  ;;  %v302_v3 = vmul.f32 %v817_v17, %v817_v17 }
 0x134   :  { %v303_v6 = vmul.f32 %v821_v21, %v821_v21  ;;  %v304_v9 = vmul.f32 %v255_v40, %v255_v40  ;;  %v305_v14 = vmul.f32 %v258_v49, %v258_v49  ;;  %v306_v15 = vmul.f32 %v596_v38, %v596_v38  ;;  %s760_s2 = smov [#allocation8]   ;;  %s761_s26 = smov [#allocation10]  }
 0x135   :  { %v315_v0 = vadd.f32 %v314_v63, %v300_v61  ;;  %v278_v1 = vadd.f32 %v277_v62, %v825_v25  ;;  %v307_v19 = vmul.f32 %v597_v45, %v597_v45  ;;  %s428_s25 = sshll.u32 %s760_s2, 4  ;;  %s438_s27 = sshll.u32 %s761_s26, 4  ;;  %s429_s25 = int_to_ptr.vmem [resolvable:$true] %s428_s25  ;;  %s856_s27 = int_to_ptr.vmem [resolvable:$true] %s438_s27 }
 0x136   :  { %s703_s28 = scalar_lea.vmem %s429_s25, 16  ;;  %s707_s29 = scalar_lea.vmem %s429_s25, 32 }
 0x137   :  { %v279_v4 = vadd.f32 %v817_v17, %v278_v1  ;;  %v316_v5 = vadd.f32 %v315_v0, %v301_v2  ;;  %p704_p10 = scmp.ne.s32.totalorder %s429_s25, %s703_s28  ;;  %p708_p11 = scmp.lt.s32.totalorder %s429_s25, %s429_s25 }
 0x138   :  { %p709_p12 = scmp.lt.s32.totalorder %s707_s29, %s703_s28 }
 0x139   :  { %v317_v7 = vadd.f32 %v316_v5, %v302_v3  ;;  %v280_v8 = vadd.f32 %v821_v21, %v279_v4 }
 0x13a   :  { %p710_p13 = por %p709_p12, %p708_p11 }
 0x13b   :  { %v281_v10 = vadd.f32 %v280_v8, %v255_v40  ;;  %v318_v11 = vadd.f32 %v317_v7, %v303_v6 }
 0x13c   :  { %p711_p0 = pnand %p710_p13, %p704_p10 }
 0x13d   :  { %v319_v12 = vadd.f32 %v318_v11, %v304_v9  ;;  %v282_v13 = vadd.f32 %v281_v10, %v258_v49 }
 0x13f   :  { %v283_v16 = vadd.f32 %v596_v38, %v282_v13  ;;  %v320_v18 = vadd.f32 %v319_v12, %v305_v14 }
 0x141   :  { %v284_v20 = vadd.f32 %v597_v45, %v283_v16  ;;  %v321_v22 = vadd.f32 %v320_v18, %v306_v15 }
 0x143   :  { %v285_v17 = vrot.slane %v284_v20, 4  ;;  %v322_v23 = vadd.f32 %v321_v22, %v307_v19 }
 0x145   :  { %v323_v24 = vrot.slane %v322_v23, 4  ;;  %v286_v25 = vadd.f32 %v285_v17, %v284_v20 }
 0x147   :  { %v287_v26 = vrot.slane %v286_v25, 2  ;;  %v324_v27 = vadd.f32 %v323_v24, %v322_v23 }
 0x149   :  { %v288_v28 = vadd.f32 %v287_v26, %v286_v25  ;;  %v325_v21 = vrot.slane %v324_v27, 2 }
 0x14b   :  { %v289_v29 = vrot.slane %v288_v28, 1  ;;  %v326_v30 = vadd.f32 %v325_v21, %v324_v27 }
 0x14d   :  { %v290_v31 = vadd.f32 %v289_v29, %v288_v28  ;;  %v327_v32 = vrot.slane %v326_v30, 1 }
 0x14f   :  { %291 = vst [vmem:[#allocation8] sm:$0x1] %v290_v31  ;;  %v328_v33 = vadd.f32 %v327_v32, %v326_v30 }
 0x150   :  { %714 = shalt.err (!%p711_p0)
}
 0x151   :  { %s715_s6 = scalar_lea.hbm %s891_s3, 16 }
 0x152   :  { %p716_p1 = scmp.ne.s32.totalorder %s891_s3, %s715_s6  ;;  %p719_p2 = scmp.lt.u32.totalorder %s715_s6, %s891_s3 }
 0x154   :  { %p721_p3 = pnand %p719_p2, %p716_p1 }
 0x156   :  { %724 = shalt.err (!%p721_p3)
}
 0x157   :  { %431 = dma.vmem_to_hbm [thread:$0]  %s429_s25, 16, %s891_s3, [#allocation9]   ;;  %329 = vst [vmem:[#allocation10] sm:$0x1] %v328_v33 }
 0x158   :  { %s725_s0 = scalar_lea.vmem %s856_s27, 16  ;;  %s729_s13 = scalar_lea.vmem %s856_s27, 32 }
 0x159   :  { %p726_p4 = scmp.ne.s32.totalorder %s856_s27, %s725_s0  ;;  %p730_p5 = scmp.lt.s32.totalorder %s856_s27, %s856_s27 }
 0x15a   :  { %p731_p6 = scmp.lt.s32.totalorder %s729_s13, %s725_s0 }
 0x15c   :  { %p732_p7 = por %p731_p6, %p730_p5 }
 0x15e   :  { %p733_p8 = pnand %p732_p7, %p726_p4 }
 0x160   :  { %736 = shalt.err (!%p733_p8)
}
 0x161   :  { %s737_s15 = scalar_lea.hbm %s892_s4, 16 }
 0x162   :  { %p738_p9 = scmp.ne.s32.totalorder %s892_s4, %s737_s15  ;;  %p741_p10 = scmp.lt.u32.totalorder %s737_s15, %s892_s4 }
 0x164   :  { %p743_p11 = pnand %p741_p10, %p738_p9 }
 0x166   :  { %746 = shalt.err (!%p743_p11)
}
 0x167   :  { %441 = dma.vmem_to_hbm [thread:$0]  %s856_s27, 16, %s892_s4, [#allocation9]  }
 0x168   :  { %751 = dma.done.wait [#allocation4], 1024  }
 0x169   :  { %752 = vsyncadd [#allocation4], 4294966272 }
 0x16a   :  { %753 = dma.done.wait [#allocation9], 32  }
 0x16b   :  { %754 = vsyncadd [#allocation9], 4294967264 }
 0x16c   :  { %451 = vsyncpa [#allocation3], 1 }
 0x16d   :  { %452 = vsyncpa [#allocation6], 1 }
 0x16e   :  { %453 = vsyncpa [#allocation4], 1 }
 0x16f   :  { %454 = vsyncpa [#allocation9], 1 }

</bundles_post_ra>
